<compile_context>
chip_gen: v7x
topology: tpu7x:2x2x1
jax: 0.10.0
libtpu: 0.0.40
codegen_flags: <defaults>
</compile_context>

<pallas_src>
import jax
import jax.numpy as jnp
from jax.experimental import pallas as pl
from jax.experimental.pallas import tpu as pltpu

HIDDEN = 768
NUM_CLASSES = 2
OUT_LANES = 128          # lane-dense output width (>= NUM_CLASSES, multiple of 128)


def _round_up(x, m):
    return ((x + m - 1) // m) * m


def cls_head_kernel(x_ref, wd_ref, bd_ref, o_ref):
    """x_ref: [tile_b, 768] CLS rows; wd_ref: [768, 1] = w[:,1]-w[:,0];
    bd_ref: [1, 1] = b[1]-b[0]; o_ref: [tile_b, OUT_LANES]."""
    # Logit difference d = x @ (w1 - w0) + (b1 - b0): one MXU matvec, f32 acc.
    d = jnp.dot(x_ref[...], wd_ref[...], preferred_element_type=jnp.float32)
    d = d + bd_ref[...]                                        # [tile_b, 1]
    # softmax over 2 classes == sigmoid of the logit difference:
    #   p1 = 1 / (1 + exp(-d)); p0 = 1 - p1   (EUP exp + EUP reciprocal,
    #   no XLU cross-lane max/sum needed)
    p1 = pl.reciprocal(1.0 + jnp.exp(-d), approx=True)
    p0 = 1.0 - p1
    tb, lanes = o_ref.shape
    col = jax.lax.broadcasted_iota(jnp.int32, (tb, lanes), 1)
    o_ref[...] = jnp.where(col == 0, p0,
                           jnp.where(col == 1, p1, 0.0)).astype(o_ref.dtype)


def cls_fc_softmax(last_hidden_state, w, b, *, max_tile_b=1024):
    """last_hidden_state: [B,S,768] f32, w: [768,2], b: [1,2] -> [B,2] softmax."""
    B, S, H = last_hidden_state.shape
    assert H == HIDDEN
    # Free row-major collapse: the CLS hidden vector is the first HIDDEN columns
    # of each [S*H] row, so the BlockSpec fetches only those 768 floats per seq.
    h2 = last_hidden_state.reshape(B, S * H)
    # Batch tile: multiple of 8 sublanes. At tile_b=1024 the double-buffered x
    # tile is ~6 MiB -> safe within v7x's 64 MiB VMEM (32 MiB scoped default)
    # as well as v5e/v6e.
    tile_b = min(max_tile_b, _round_up(B, 8))
    b_pad = _round_up(B, tile_b)
    if b_pad != B:
        # TODO(synk): for large B not divisible by tile_b this pad copies the
        # activation; production callers should feed a tile-divisible batch.
        h2 = jnp.pad(h2, ((0, b_pad - B), (0, 0)))
    w_diff = (w[:, 1] - w[:, 0]).reshape(HIDDEN, 1).astype(jnp.float32)
    b_diff = (b[0, 1] - b[0, 0]).reshape(1, 1).astype(jnp.float32)

    out = pl.pallas_call(
        cls_head_kernel,
        out_shape=jax.ShapeDtypeStruct((b_pad, OUT_LANES), jnp.float32),
        grid=(b_pad // tile_b,),
        in_specs=[
            # DMA only the CLS token's 768 floats of each sequence row.
            pl.BlockSpec((tile_b, HIDDEN), lambda i: (i, 0)),
            pl.BlockSpec((HIDDEN, 1), lambda i: (0, 0)),
            pl.BlockSpec((1, 1), lambda i: (0, 0)),
        ],
        out_specs=pl.BlockSpec((tile_b, OUT_LANES), lambda i: (i, 0)),
        compiler_params=pltpu.CompilerParams(
            dimension_semantics=("parallel",)),   # megacore-shard the batch axis
    )(h2, w_diff, b_diff)
    return out[:B, :NUM_CLASSES]


# TODO(synk): the transformers.BertModel pretrained backbone (frozen, no_grad)
# cannot be loaded here; it is replaced by a deterministic synthetic encoder
# stand-in below that produces last_hidden_state of shape [B, S, 768].
def synthetic_bert_last_hidden_state(input_ids, attention_mask, token_type_ids,
                                     key, vocab_size=128):
    k_tok, k_seg = jax.random.split(key)
    tok_emb = jax.random.normal(k_tok, (vocab_size, HIDDEN), jnp.float32) * 0.02
    seg_emb = jax.random.normal(k_seg, (2, HIDDEN), jnp.float32) * 0.02
    h = tok_emb[input_ids] + seg_emb[token_type_ids]          # [B, S, H]
    h = h * attention_mask[..., None].astype(jnp.float32)     # mask padding
    return h


class Model:
    """JAX/Pallas reimplementation of the PyTorch Model (fc + softmax head)."""

    def __init__(self, key):
        k_w, k_b, self.bert_key = jax.random.split(key, 3)
        # torch.nn.Linear(768, 2): weight [2, 768], bias [2]; store transposed.
        w_torch = jax.random.normal(k_w, (NUM_CLASSES, HIDDEN), jnp.float32) * 0.02
        self.w = jnp.transpose(w_torch)                        # [768, 2]
        self.b = jax.random.normal(k_b, (1, NUM_CLASSES), jnp.float32) * 0.02

    def __call__(self, input_ids, attention_mask, token_type_ids):
        last_hidden_state = synthetic_bert_last_hidden_state(
            input_ids, attention_mask, token_type_ids, self.bert_key)
        # CLS slice is fused into the kernel's BlockSpec (no HBM round trip).
        return cls_fc_softmax(last_hidden_state, self.w, self.b)   # [B, 2]


if __name__ == "__main__":
    key = jax.random.PRNGKey(0)
    k_model, k_ids = jax.random.split(key)

    B, S = 2, 8
    input_ids = jax.random.randint(k_ids, (B, S), 0, 128, dtype=jnp.int32)
    attention_mask = jnp.ones((B, S), dtype=jnp.int32)
    token_type_ids = jnp.zeros((B, S), dtype=jnp.int32)

    model = Model(k_model)
    out = jax.block_until_ready(model(input_ids, attention_mask, token_type_ids))

    # sanity: shape, rows sum to 1, and match plain XLA linear+softmax reference
    assert out.shape == (B, NUM_CLASSES)
    assert jnp.allclose(jnp.sum(out, axis=1), 1.0, atol=1e-5)
    h = synthetic_bert_last_hidden_state(
        input_ids, attention_mask, token_type_ids, model.bert_key)
    ref = jax.nn.softmax(h[:, 0] @ model.w + model.b, axis=1)
    assert jnp.allclose(out, ref, atol=5e-3)
    print("KERNEL_OK")
</pallas_src>

<mosaic_0001>
module attributes {stable_mosaic.version = 11 : i64} {
  func.func @cls_head_kernel(%arg0: i32, %arg1: memref<8x768xf32, #tpu.memory_space<vmem>>, %arg2: memref<768x1xf32, #tpu.memory_space<vmem>>, %arg3: memref<1x1xf32, #tpu.memory_space<vmem>>, %arg4: memref<8x128xf32, #tpu.memory_space<vmem>>) attributes {dimension_semantics = [#tpu.dimension_semantics<parallel>], iteration_bounds = array<i64: 1>, scalar_prefetch = 0 : i64, scratch_operands = 0 : i64, tpu.core_type = #tpu.core_type<tc>, window_params = [{transform_indices = @transform_0, window_bounds = array<i64: 8, 768>}, {pipeline_mode = #tpu.pipeline_mode<synchronous>, transform_indices = @transform_1, window_bounds = array<i64: 768, 1>}, {pipeline_mode = #tpu.pipeline_mode<synchronous>, transform_indices = @transform_2, window_bounds = array<i64: 1, 1>}, {transform_indices = @transform_3, window_bounds = array<i64: 8, 128>}]} {
    %c0 = arith.constant 0 : index
    %c0_0 = arith.constant 0 : index
    %0 = vector.load %arg1[%c0, %c0_0] : memref<8x768xf32, #tpu.memory_space<vmem>>, vector<8x768xf32>
    %c0_1 = arith.constant 0 : index
    %c0_2 = arith.constant 0 : index
    %1 = vector.load %arg2[%c0_1, %c0_2] : memref<768x1xf32, #tpu.memory_space<vmem>>, vector<768x1xf32>
    %cst = arith.constant dense<0.000000e+00> : vector<8x1xf32>
    %2 = tpu.matmul %0, %1, %cst {dimension_numbers = #tpu.dot_dimension_numbers<[1], [0], [0], [1], [0, 0, 1, 1], [], []>} : vector<8x768xf32>, vector<768x1xf32>, vector<8x1xf32> -> vector<8x1xf32>
    %c0_3 = arith.constant 0 : index
    %c0_4 = arith.constant 0 : index
    %3 = vector.load %arg3[%c0_3, %c0_4] : memref<1x1xf32, #tpu.memory_space<vmem>>, vector<1x1xf32>
    %4 = vector.broadcast %3 : vector<1x1xf32> to vector<8x1xf32>
    %5 = arith.addf %2, %4 : vector<8x1xf32>
    %cst_5 = arith.constant 0.000000e+00 : f32
    %6 = vector.broadcast %cst_5 : f32 to vector<8x1xf32>
    %7 = arith.subf %6, %5 : vector<8x1xf32>
    %8 = math.exp %7 : vector<8x1xf32>
    %cst_6 = arith.constant 1.000000e+00 : f32
    %9 = vector.broadcast %cst_6 : f32 to vector<8x1xf32>
    %10 = arith.addf %9, %8 : vector<8x1xf32>
    %11 = tpu.reciprocal %10 {approx = true} : vector<8x1xf32> -> vector<8x1xf32>
    %cst_7 = arith.constant 1.000000e+00 : f32
    %12 = vector.broadcast %cst_7 : f32 to vector<8x1xf32>
    %13 = arith.subf %12, %11 : vector<8x1xf32>
    %14 = tpu.iota {dimensions = array<i32: 1>} : vector<8x128xi32>
    %c0_i32 = arith.constant 0 : i32
    %15 = vector.broadcast %c0_i32 : i32 to vector<8x128xi32>
    %16 = arith.cmpi eq, %14, %15 : vector<8x128xi32>
    %c1_i32 = arith.constant 1 : i32
    %17 = vector.broadcast %c1_i32 : i32 to vector<8x128xi32>
    %18 = arith.cmpi eq, %14, %17 : vector<8x128xi32>
    %cst_8 = arith.constant 0.000000e+00 : f32
    %19 = vector.shape_cast %11 : vector<8x1xf32> to vector<8x1xf32>
    %20 = vector.broadcast %19 : vector<8x1xf32> to vector<8x128xf32>
    %21 = vector.broadcast %cst_8 : f32 to vector<8x128xf32>
    %22 = arith.select %18, %20, %21 : vector<8x128xi1>, vector<8x128xf32>
    %23 = vector.shape_cast %13 : vector<8x1xf32> to vector<8x1xf32>
    %24 = vector.broadcast %23 : vector<8x1xf32> to vector<8x128xf32>
    %25 = arith.select %16, %24, %22 : vector<8x128xi1>, vector<8x128xf32>
    %c0_9 = arith.constant 0 : index
    %c0_10 = arith.constant 0 : index
    %26 = vector.load %arg4[%c0_9, %c0_10] : memref<8x128xf32, #tpu.memory_space<vmem>>, vector<8x128xf32>
    tpu.vector_store %arg4[%c0_9, %c0_10], %25 {strides = array<i32>} : memref<8x128xf32, #tpu.memory_space<vmem>>, vector<8x128xf32>,
    return
  }
  func.func @transform_0(%arg0: i32) -> (i32, i32) {
    %c0_i32 = arith.constant 0 : i32
    %c0_i32_0 = arith.constant 0 : i32
    return %arg0, %c0_i32 : i32, i32
  }
  func.func @transform_1(%arg0: i32) -> (i32, i32) {
    %c0_i32 = arith.constant 0 : i32
    %c0_i32_0 = arith.constant 0 : i32
    %c0_i32_1 = arith.constant 0 : i32
    return %c0_i32, %c0_i32_0 : i32, i32
  }
  func.func @transform_2(%arg0: i32) -> (i32, i32) {
    %c0_i32 = arith.constant 0 : i32
    %c0_i32_0 = arith.constant 0 : i32
    %c0_i32_1 = arith.constant 0 : i32
    return %c0_i32, %c0_i32_0 : i32, i32
  }
  func.func @transform_3(%arg0: i32) -> (i32, i32) {
    %c0_i32 = arith.constant 0 : i32
    %c0_i32_0 = arith.constant 0 : i32
    return %arg0, %c0_i32 : i32, i32
  }
}

</mosaic_0001>

<bundles_post_ra>
// kernel: tpu_custom_call.1
= control target key start
LH: loop header
LB: loop body
LE: loop exit
PB: predicated region body
PF: predicated region fallthrough
CT: control target
= control target key end

     0   :  { %s949_s0 = inlined_call_operand.vmem [shape: f32[8,6144], index: 0, kind: input, shape index: {}]   ;;  %s950_s1 = inlined_call_operand.vmem [shape: f32[768,1], index: 1, kind: input, shape index: {}]   ;;  %s951_s2 = inlined_call_operand.<no memory space> [shape: f32[1,1], index: 2, kind: input, shape index: {}]   ;;  %s952_s3 = inlined_call_operand.hbm [shape: f32[8,128], index: 3, kind: output, shape index: {}]  }
   0x1   :  { %v8_v0 = vstv %s951_s2 }
   0x2   :  { %9 = vst [vmem:[#allocation2] sm:$0x1] %v8_v0 }
   0x3   :  { %v39_v1 = vld [vmem:[%s950_s1 + $0x80] sm:$0xff]  ;;  %v40_v2 = vld [vmem:[%s950_s1 + $0x88] sm:$0xff]  ;;  %v41_v12 = vld [vmem:[%s950_s1 + $0x90] sm:$0xff] }
   0x4   :  { %v23_v3 = vld [vmem:[%s950_s1] sm:$0xff]  ;;  %v479_v4 = vpack.c.bf16 %v40_v2, %v39_v1  ;;  %v24_v5 = vld [vmem:[%s950_s1 + $0x8] sm:$0xff]  ;;  %v42_v14 = vld [vmem:[%s950_s1 + $0x98] sm:$0xff] }
   0x5   :  { %v71_v6 = vld [vmem:[%s950_s1 + $0x180] sm:$0xff]  ;;  %v72_v7 = vld [vmem:[%s950_s1 + $0x188] sm:$0xff]  ;;  %v481_v8 = vpack.c.bf16 %v24_v5, %v23_v3  ;;  %v25_v15 = vld [vmem:[%s950_s1 + $0x10] sm:$0xff]  ;;  %v483_v17 = vpack.c.bf16 %v42_v14, %v41_v12 }
   0x6   :  { %v511_v9 = vpack.c.bf16 %v72_v7, %v71_v6  ;;  %v55_v10 = vld [vmem:[%s950_s1 + $0x100] sm:$0xff]  ;;  %v56_v11 = vld [vmem:[%s950_s1 + $0x108] sm:$0xff]  ;;  %480 = vmatprep.subr.bf16.mxu0 %v479_v4  ;;  %v26_v16 = vld [vmem:[%s950_s1 + $0x18] sm:$0xff] }
   0x7   :  { %v513_v13 = vpack.c.bf16 %v56_v11, %v55_v10  ;;  %482 = vmatpush3.bf16.msra.mxu0 %v481_v8  ;;  %v485_v18 = vpack.c.bf16 %v26_v16, %v25_v15  ;;  %v73_v19 = vld [vmem:[%s950_s1 + $0x190] sm:$0xff]  ;;  %v74_v20 = vld [vmem:[%s950_s1 + $0x198] sm:$0xff]  ;;  %v43_v24 = vld [vmem:[%s950_s1 + $0xa0] sm:$0xff] }
   0x8   :  { %512 = vmatprep.subr.bf16.mxu1 %v511_v9  ;;  %v57_v21 = vld [vmem:[%s950_s1 + $0x110] sm:$0xff]  ;;  %v515_v22 = vpack.c.bf16 %v74_v20, %v73_v19  ;;  %v58_v23 = vld [vmem:[%s950_s1 + $0x118] sm:$0xff]  ;;  %v44_v25 = vld [vmem:[%s950_s1 + $0xa8] sm:$0xff]  ;;  %484 = vmatprep.subr.bf16.mxu0 %v483_v17 }
   0x9   :  { %514 = vmatpush3.bf16.msra.mxu1 %v513_v13  ;;  %v517_v26 = vpack.c.bf16 %v58_v23, %v57_v21  ;;  %v487_v27 = vpack.c.bf16 %v44_v25, %v43_v24  ;;  %v27_v28 = vld [vmem:[%s950_s1 + $0x20] sm:$0xff]  ;;  %v28_v29 = vld [vmem:[%s950_s1 + $0x28] sm:$0xff]  ;;  %v45_v36 = vld [vmem:[%s950_s1 + $0xb0] sm:$0xff] }
   0xa   :  { %v75_v30 = vld [vmem:[%s950_s1 + $0x1a0] sm:$0xff]  ;;  %516 = vmatprep.subr.bf16.mxu1 %v515_v22  ;;  %v76_v31 = vld [vmem:[%s950_s1 + $0x1a8] sm:$0xff]  ;;  %v489_v34 = vpack.c.bf16 %v28_v29, %v27_v28  ;;  %v46_v37 = vld [vmem:[%s950_s1 + $0xb8] sm:$0xff] }
   0xb   :  { %v59_v32 = vld [vmem:[%s950_s1 + $0x120] sm:$0xff]  ;;  %v60_v33 = vld [vmem:[%s950_s1 + $0x128] sm:$0xff]  ;;  %486 = vmatpush3.bf16.msra.mxu0 %v485_v18  ;;  %v519_v35 = vpack.c.bf16 %v76_v31, %v75_v30  ;;  %v29_v38 = vld [vmem:[%s950_s1 + $0x30] sm:$0xff]  ;;  %v491_v40 = vpack.c.bf16 %v46_v37, %v45_v36 }
   0xc   :  { %488 = vmatprep.subr.bf16.mxu0 %v487_v27  ;;  %v521_v39 = vpack.c.bf16 %v60_v33, %v59_v32  ;;  %v30_v41 = vld [vmem:[%s950_s1 + $0x38] sm:$0xff]  ;;  %v77_v42 = vld [vmem:[%s950_s1 + $0x1b0] sm:$0xff]  ;;  %v47_v47 = vld [vmem:[%s950_s1 + $0xc0] sm:$0xff] }
   0xd   :  { %518 = vmatpush3.bf16.msra.mxu1 %v517_v26  ;;  %v78_v43 = vld [vmem:[%s950_s1 + $0x1b8] sm:$0xff]  ;;  %v61_v45 = vld [vmem:[%s950_s1 + $0x130] sm:$0xff]  ;;  %v48_v48 = vld [vmem:[%s950_s1 + $0xc8] sm:$0xff]  ;;  %v493_v49 = vpack.c.bf16 %v30_v41, %v29_v38 }
   0xe   :  { %520 = vmatprep.subr.bf16.mxu1 %v519_v35  ;;  %v523_v44 = vpack.c.bf16 %v78_v43, %v77_v42  ;;  %v62_v46 = vld [vmem:[%s950_s1 + $0x138] sm:$0xff]  ;;  %v79_v50 = vld [vmem:[%s950_s1 + $0x1c0] sm:$0xff]  ;;  %v80_v51 = vld [vmem:[%s950_s1 + $0x1c8] sm:$0xff]  ;;  %v495_v53 = vpack.c.bf16 %v48_v48, %v47_v47 }
   0xf   :  { %490 = vmatpush3.bf16.msra.mxu0 %v489_v34  ;;  %v525_v52 = vpack.c.bf16 %v62_v46, %v61_v45  ;;  %v31_v54 = vld [vmem:[%s950_s1 + $0x40] sm:$0xff]  ;;  %v32_v55 = vld [vmem:[%s950_s1 + $0x48] sm:$0xff]  ;;  %v527_v57 = vpack.c.bf16 %v80_v51, %v79_v50  ;;  %v49_v59 = vld [vmem:[%s950_s1 + $0xd0] sm:$0xff] }
  0x10   :  { %492 = vmatprep.subr.bf16.mxu0 %v491_v40  ;;  %v63_v56 = vld [vmem:[%s950_s1 + $0x140] sm:$0xff]  ;;  %v64_v58 = vld [vmem:[%s950_s1 + $0x148] sm:$0xff]  ;;  %v50_v60 = vld [vmem:[%s950_s1 + $0xd8] sm:$0xff]  ;;  %v497_v63 = vpack.c.bf16 %v32_v55, %v31_v54 }
  0x11   :  { %522 = vmatpush3.bf16.msra.mxu1 %v521_v39  ;;  %v81_v61 = vld [vmem:[%s950_s1 + $0x1d0] sm:$0xff]  ;;  %v82_v62 = vld [vmem:[%s950_s1 + $0x1d8] sm:$0xff]  ;;  %v529_v0 = vpack.c.bf16 %v64_v58, %v63_v56  ;;  %v499_v1 = vpack.c.bf16 %v50_v60, %v49_v59  ;;  %v51_v7 = vld [vmem:[%s950_s1 + $0xe0] sm:$0xff] }
  0x12   :  { %524 = vmatprep.subr.bf16.mxu1 %v523_v44  ;;  %v33_v2 = vld [vmem:[%s950_s1 + $0x50] sm:$0xff]  ;;  %v34_v3 = vld [vmem:[%s950_s1 + $0x58] sm:$0xff]  ;;  %v531_v5 = vpack.c.bf16 %v82_v62, %v81_v61  ;;  %v52_v8 = vld [vmem:[%s950_s1 + $0xe8] sm:$0xff] }
  0x13   :  { %494 = vmatpush3.bf16.msra.mxu0 %v493_v49  ;;  %v65_v4 = vld [vmem:[%s950_s1 + $0x150] sm:$0xff]  ;;  %v66_v6 = vld [vmem:[%s950_s1 + $0x158] sm:$0xff]  ;;  %v83_v9 = vld [vmem:[%s950_s1 + $0x1e0] sm:$0xff]  ;;  %v501_v11 = vpack.c.bf16 %v34_v3, %v33_v2  ;;  %v503_v15 = vpack.c.bf16 %v52_v8, %v51_v7 }
  0x14   :  { %496 = vmatprep.subr.bf16.mxu0 %v495_v53  ;;  %v84_v10 = vld [vmem:[%s950_s1 + $0x1e8] sm:$0xff]  ;;  %v35_v12 = vld [vmem:[%s950_s1 + $0x60] sm:$0xff]  ;;  %v533_v14 = vpack.c.bf16 %v66_v6, %v65_v4  ;;  %v53_v20 = vld [vmem:[%s950_s1 + $0xf0] sm:$0xff] }
  0x15   :  { %526 = vmatpush3.bf16.msra.mxu1 %v525_v52  ;;  %v18_v13 = vld [vmem:[%s949_s0 + $0x8] sm:$0xff]  ;;  %v67_v17 = vld [vmem:[%s950_s1 + $0x160] sm:$0xff]  ;;  %v535_v19 = vpack.c.bf16 %v84_v10, %v83_v9  ;;  %v54_v21 = vld [vmem:[%s950_s1 + $0xf8] sm:$0xff] }
  0x16   :  { %528 = vmatprep.subr.bf16.mxu1 %v527_v57  ;;  %v36_v16 = vld [vmem:[%s950_s1 + $0x68] sm:$0xff]  ;;  %190 = vmatprep.mubr.f32.mxu0 %v18_v13  ;;  %v20_v22 = vld [vmem:[%s949_s0 + $0x18] sm:$0xff]  ;;  %v85_v23 = vld [vmem:[%s950_s1 + $0x1f0] sm:$0xff]  ;;  %v507_v27 = vpack.c.bf16 %v54_v21, %v53_v20 }
  0x17   :  { %498 = vmatpush3.bf16.msra.mxu0 %v497_v63  ;;  %v68_v18 = vld [vmem:[%s950_s1 + $0x168] sm:$0xff]  ;;  %v86_v24 = vld [vmem:[%s950_s1 + $0x1f8] sm:$0xff]  ;;  %260 = vmatprep.mubr.f32.mxu1 %v20_v22  ;;  %v505_v25 = vpack.c.bf16 %v36_v16, %v35_v12  ;;  %v37_v28 = vld [vmem:[%s950_s1 + $0x70] sm:$0xff] }
  0x18   :  { %500 = vmatprep.subr.bf16.mxu0 %v499_v1  ;;  %v537_v26 = vpack.c.bf16 %v68_v18, %v67_v17  ;;  %v38_v29 = vld [vmem:[%s950_s1 + $0x78] sm:$0xff]  ;;  %v69_v30 = vld [vmem:[%s950_s1 + $0x170] sm:$0xff]  ;;  %v539_v31 = vpack.c.bf16 %v86_v24, %v85_v23  ;;  %v103_v33 = vld [vmem:[%s950_s1 + $0x280] sm:$0xff] }
  0x19   :  { %530 = vmatpush3.bf16.msra.mxu1 %v529_v0  ;;  %v70_v32 = vld [vmem:[%s950_s1 + $0x178] sm:$0xff]  ;;  %v104_v34 = vld [vmem:[%s950_s1 + $0x288] sm:$0xff]  ;;  %v509_v35 = vpack.c.bf16 %v38_v29, %v37_v28  ;;  %v87_v38 = vld [vmem:[%s950_s1 + $0x200] sm:$0xff] }
  0x1a   :  { %532 = vmatprep.subr.bf16.mxu1 %v531_v5  ;;  %v541_v36 = vpack.c.bf16 %v70_v32, %v69_v30  ;;  %v543_v37 = vpack.c.bf16 %v104_v34, %v103_v33  ;;  %v88_v39 = vld [vmem:[%s950_s1 + $0x208] sm:$0xff]  ;;  %v105_v40 = vld [vmem:[%s950_s1 + $0x290] sm:$0xff]  ;;  %v106_v41 = vld [vmem:[%s950_s1 + $0x298] sm:$0xff] }
  0x1b   :  { %502 = vmatpush3.bf16.msra.mxu0 %v501_v11  ;;  %v17_v42 = vld [vmem:[%s949_s0] sm:$0xff]  ;;  %v545_v43 = vpack.c.bf16 %v88_v39, %v87_v38  ;;  %v19_v44 = vld [vmem:[%s949_s0 + $0x10] sm:$0xff]  ;;  %v547_v45 = vpack.c.bf16 %v106_v41, %v105_v40  ;;  %v90_v47 = vld [vmem:[%s950_s1 + $0x218] sm:$0xff] }
  0x1c   :  { %504 = vmatprep.subr.bf16.mxu0 %v503_v15  ;;  %v89_v46 = vld [vmem:[%s950_s1 + $0x210] sm:$0xff]  ;;  %v107_v48 = vld [vmem:[%s950_s1 + $0x2a0] sm:$0xff]  ;;  %v108_v49 = vld [vmem:[%s950_s1 + $0x2a8] sm:$0xff] }
  0x1d   :  { %534 = vmatpush3.bf16.msra.mxu1 %v533_v14  ;;  %v22_v50 = vld [vmem:[%s949_s0 + $0x28] sm:$0xff] }
  0x1e   :  { %536 = vmatprep.subr.bf16.mxu1 %v535_v19 }
  0x1f   :  { %506 = vmatpush3.bf16.msra.mxu0 %v505_v25 }
  0x20   :  { %508 = vmatprep.subr.bf16.mxu0 %v507_v27 }
  0x21   :  { %538 = vmatpush3.bf16.msra.mxu1 %v537_v26 }
  0x22   :  { %540 = vmatprep.subr.bf16.mxu1 %v539_v31 }
  0x23   :  { %510 = vmatpush3.bf16.msra.mxu0 %v509_v35 }
  0x24   :  { %544 = vmatprep.subr.bf16.mxu0 %v543_v37 }
  0x25   :  { %542 = vmatpush3.bf16.msra.mxu1 %v541_v36 }
  0x26   :  { %10 = vsyncpa [#allocation4], 0  ;;  %191 = vmatmul.mubr.f32.vlgmr.msra.gmra.mrb[0].mxu0 %v17_v42  ;;  %v549_v51 = vpack.c.bf16 %v90_v47, %v89_v46  ;;  %v551_v52 = vpack.c.bf16 %v108_v49, %v107_v48  ;;  %v91_v53 = vld [vmem:[%s950_s1 + $0x220] sm:$0xff]  ;;  %v92_v54 = vld [vmem:[%s950_s1 + $0x228] sm:$0xff]  ;;  %v606_v23 = vmov 0  }
  0x27   :  { %546 = vmatpush3.bf16.msra.mxu0 %v545_v43  ;;  %330 = vmatprep.mubr.f32.mxu0 %v22_v50  ;;  %v109_v55 = vld [vmem:[%s950_s1 + $0x2b0] sm:$0xff]  ;;  %v110_v56 = vld [vmem:[%s950_s1 + $0x2b8] sm:$0xff]  ;;  %v553_v57 = vpack.c.bf16 %v92_v54, %v91_v53  ;;  %v111_v61 = vld [vmem:[%s950_s1 + $0x2c0] sm:$0xff]  ;;  %v342_v43 = vlaneseq }
  0x28   :  { %261 = vmatmul.mubr.f32.vlgmr.msra.gmra.mrb[0].mxu1 %v19_v44  ;;  %548 = vmatprep.subr.bf16.mxu0 %v547_v45  ;;  %v555_v58 = vpack.c.bf16 %v110_v56, %v109_v55  ;;  %v93_v59 = vld [vmem:[%s950_s1 + $0x230] sm:$0xff]  ;;  %v94_v60 = vld [vmem:[%s950_s1 + $0x238] sm:$0xff]  ;;  %v112_v62 = vld [vmem:[%s950_s1 + $0x2c8] sm:$0xff] }
  0x29   :  { %v557_v63 = vpack.c.bf16 %v94_v60, %v93_v59  ;;  %v559_v0 = vpack.c.bf16 %v112_v62, %v111_v61  ;;  %v95_v1 = vld [vmem:[%s950_s1 + $0x240] sm:$0xff]  ;;  %v96_v2 = vld [vmem:[%s950_s1 + $0x248] sm:$0xff]  ;;  %v113_v3 = vld [vmem:[%s950_s1 + $0x2d0] sm:$0xff]  ;;  %577 = vset.pattern.permute.xlu0 %v606_v23  ;;  %v343_v44 = vand.u32 127, %v342_v43 }
  0x2a   :  { %v114_v4 = vld [vmem:[%s950_s1 + $0x2d8] sm:$0xff]  ;;  %v561_v5 = vpack.c.bf16 %v96_v2, %v95_v1  ;;  %v97_v7 = vld [vmem:[%s950_s1 + $0x250] sm:$0xff]  ;;  %v115_v9 = vld [vmem:[%s950_s1 + $0x2e0] sm:$0xff] }
  0x2b   :  { %550 = vmatpush3.bf16.msra.mxu0 %v549_v51  ;;  %v563_v6 = vpack.c.bf16 %v114_v4, %v113_v3  ;;  %v98_v8 = vld [vmem:[%s950_s1 + $0x258] sm:$0xff]  ;;  %v116_v10 = vld [vmem:[%s950_s1 + $0x2e8] sm:$0xff]  ;;  %v99_v13 = vld [vmem:[%s950_s1 + $0x260] sm:$0xff]  ;;  %vm345_vm0 = vcmp.eq.s32.totalorder %v343_v44, 1  ;;  %vm344_vm1 = vcmp.eq.s32.totalorder %v343_v44, 0 }
  0x2c   :  { %552 = vmatprep.subr.bf16.mxu0 %v551_v52  ;;  %v565_v11 = vpack.c.bf16 %v98_v8, %v97_v7  ;;  %v567_v12 = vpack.c.bf16 %v116_v10, %v115_v9  ;;  %v100_v14 = vld [vmem:[%s950_s1 + $0x268] sm:$0xff]  ;;  %v117_v15 = vld [vmem:[%s950_s1 + $0x2f0] sm:$0xff]  ;;  %v118_v16 = vld [vmem:[%s950_s1 + $0x2f8] sm:$0xff] }
  0x2d   :  { %v569_v17 = vpack.c.bf16 %v100_v14, %v99_v13  ;;  %v571_v18 = vpack.c.bf16 %v118_v16, %v117_v15  ;;  %v101_v19 = vld [vmem:[%s950_s1 + $0x270] sm:$0xff]  ;;  %v102_v20 = vld [vmem:[%s950_s1 + $0x278] sm:$0xff]  ;;  %v21_v22 = vld [vmem:[%s949_s0 + $0x20] sm:$0xff]  ;;  %s607_s0 = smov [#allocation3]  }
  0x2e   :  { %v573_v21 = vpack.c.bf16 %v102_v20, %v101_v19  ;;  %v373_v25 = vld [vmem:[#allocation2] ss:$0 sm:$0xff]  ;;  %s365_s1 = sshll.u32 %s607_s0, 4  ;;  %s366_s1 = int_to_ptr.vmem [resolvable:$true] %s365_s1 }
  0x2f   :  { %554 = vmatpush3.bf16.msra.mxu0 %v553_v57  ;;  %s582_s22 = scalar_lea.vmem %s366_s1, 128  ;;  %p587_p1 = scmp.lt.s32.totalorder %s366_s1, %s366_s1 }
  0x30   :  { %556 = vmatprep.subr.bf16.mxu0 %v555_v58  ;;  %p583_p0 = scmp.ne.s32.totalorder %s366_s1, %s582_s22  ;;  %p588_p2 = scmp.lt.s32.totalorder %s582_s22, %s582_s22 }
  0x32   :  { %p589_p3 = por %p588_p2, %p587_p1 }
  0x33   :  { %558 = vmatpush3.bf16.msra.mxu0 %v557_v63 }
  0x34   :  { %560 = vmatprep.subr.bf16.mxu0 %v559_v0  ;;  %p590_p4 = pnand %p589_p3, %p583_p0 }
  0x37   :  { %562 = vmatpush3.bf16.msra.mxu0 %v561_v5 }
  0x38   :  { %564 = vmatprep.subr.bf16.mxu0 %v563_v6 }
  0x3b   :  { %566 = vmatpush3.bf16.msra.mxu0 %v565_v11 }
  0x3c   :  { %568 = vmatprep.subr.bf16.mxu0 %v567_v12 }
  0x3f   :  { %570 = vmatpush3.bf16.msra.mxu0 %v569_v17 }
  0x40   :  { %572 = vmatprep.subr.bf16.mxu0 %v571_v18 }
  0x43   :  { %574 = vmatpush3.bf16.msra.mxu0 %v573_v21 }
  0x46   :  { %331 = vmatmul.mubr.f32.vlgmr.msra.gmra.mrb[2].mxu0 %v21_v22 }
  0xf9   :  { %v406_v24 = vpop.f32.mrb[0].mxu0 }
  0xfa   :  { %v407_v26 = vpop.f32.mrb[1].mxu0 }
  0xfb   :  { %v441_v27 = vpop.f32.mrb[0].mxu1  ;;  %v408_v28 = vadd.f32 %v407_v26, %v406_v24 }
  0xfc   :  { %v442_v29 = vpop.f32.mrb[1].mxu1 }
  0xfd   :  { %v443_v30 = vadd.f32 %v442_v29, %v441_v27  ;;  %v193_v31 = vadd.f32 %v408_v28, %v373_v25 }
  0xff   :  { %v263_v32 = vadd.f32 %v443_v30, %v193_v31 }
 0x119   :  { %v476_v33 = vpop.f32.mrb[2].mxu0 }
 0x11a   :  { %v477_v34 = vpop.f32.mrb[3].mxu0 }
 0x11b   :  { %v478_v35 = vadd.f32 %v477_v34, %v476_v33 }
 0x11d   :  { %v333_v36 = vadd.f32 %v478_v35, %v263_v32 }
 0x11f   :  { %v336_v37 = vsub.f32 0.0, %v333_v36 }
 0x121   :  { %v337_v38 = vmul.f32 1.442695, %v336_v37 }
 0x123   :  { %578 = vpow2.f32 %v337_v38 }
 0x12d   :  { %v579_v39 = vpop.eup %578 }
 0x12e   :  { %v339_v40 = vadd.f32 1.0, %v579_v39 }
 0x130   :  { %580 = vrcp.f32 %v339_v40 }
 0x13a   :  { %v581_v41 = vpop.eup %580 }
 0x13b   :  { %348 = vperm.xlu0 %577, %v581_v41   ;;  %v341_v42 = vsub.f32 1.0, %v581_v41 }
 0x13f   :  { %354 = vperm.xlu0 %577, %v341_v42  }
 0x1ba   :  { %v349_v45 = vpop.permute.xlu0 %348 }
 0x1bb   :  { %v351_v46 = vsel %vm345_vm0, %v349_v45, 0.0 }
 0x1be   :  { %v355_v47 = vpop.permute.xlu0 %354 }
 0x1bf   :  { %v357_v48 = vsel %vm344_vm1, %v355_v47, %v351_v46 }
 0x1c0   :  { %358 = vst [vmem:[#allocation3] sm:$0xff] %v357_v48 }
 0x1c1   :  { %593 = shalt.err (!%p590_p4)
}
 0x1c2   :  { %s594_s24 = scalar_lea.hbm %s952_s3, 128 }
 0x1c3   :  { %p595_p5 = scmp.ne.s32.totalorder %s952_s3, %s594_s24  ;;  %p598_p6 = scmp.lt.u32.totalorder %s594_s24, %s952_s3 }
 0x1c5   :  { %p600_p7 = pnand %p598_p6, %p595_p5 }
 0x1c7   :  { %603 = shalt.err (!%p600_p7)
}
 0x1c8   :  { %368 = dma.vmem_to_hbm [thread:$0]  %s366_s1, 128, %s952_s3, [#allocation4]  }
 0x1c9   :  { %604 = dma.done.wait [#allocation4], 128  }
 0x1ca   :  { %605 = vsyncadd [#allocation4], 4294967168 }
 0x1cb   :  { %372 = vsyncpa [#allocation4], 1 }

</bundles_post_ra>
